<compile_context>
chip_gen: v5e
topology: v5e:2x2
jax: 0.10.0
libtpu: 0.0.40
codegen_flags: <defaults>
</compile_context>

<pallas_src>
import jax
import jax.numpy as jnp
import numpy as np
from jax.experimental import pallas as pl
from jax.experimental.pallas import tpu as pltpu


def _round_up(a, b):
    return -(-a // b) * b


# ----------------------------- Pallas kernel --------------------------------
def _make_gated_conv_kernel(k, rate, kcin, ckp, tm, gated, epilogue_dtype):
    """kcin = k*Cin rows per horizontal-tap group; ckp = sublane-aligned group."""

    def kernel(x_ref, h_ref, w_ref, o_ref, p_ref):
        # x_ref: (kcin, tm)    current spatial tile (vertical taps pre-stacked)
        # h_ref: (kcin, 128)   right halo: first 128 lanes after this tile
        # w_ref: (Cout, k*ckp) fused conv weights
        # p_ref: (k*ckp, tm)   VMEM scratch: fused im2col operand
        x = x_ref[...]
        h = h_ref[...]
        if ckp > kcin:
            zpad = jnp.zeros((ckp - kcin, tm), dtype=p_ref.dtype)

        # Build the fused im2col operand: one horizontal (kj) tap group per
        # ckp-aligned row block.  Each tap is at most two contiguous lane
        # pieces (tile + tiny halo) -> no concatenate, no duplicate tile read.
        for kj in range(k):
            d = kj * rate
            base = kj * ckp
            if d == 0:
                p_ref[base:base + kcin, :] = x
            else:
                p_ref[base:base + kcin, :tm - d] = x[:, d:]
                p_ref[base:base + kcin, tm - d:] = h[:, :d]
            if ckp > kcin:
                # keep alignment-padding rows zero (they meet zero weight
                # columns, but uninitialized VMEM could hold NaN bit patterns)
                p_ref[base + kcin:base + ckp, :] = zpad

        # ONE fused MXU matmul: contraction depth k*k*Cin (padded to k*ckp).
        acc = jnp.dot(w_ref[...], p_ref[...],
                      preferred_element_type=jnp.float32)     # (Cout, tm) f32

        if gated:
            # elu(a) * sigmoid(a) with a single exp + one approx reciprocal:
            #   t = exp(-|a|), r = 1/(1+t)
            #   out = r * where(a > 0, a, (t - 1) * t)
            a = acc.astype(epilogue_dtype)
            t = jnp.exp(-jnp.abs(a))
            r = pl.reciprocal(1.0 + t, approx=True)
            out = r * jnp.where(a > 0, a, (t - 1.0) * t)
        else:
            out = acc
        o_ref[...] = out.astype(o_ref.dtype)

    return kernel


# ------------------------------- JAX wrapper ---------------------------------
def gated_conv_forward(x, weight, *, stride=1, rate=1, padding="auto",
                       gated=True, compute_dtype=jnp.bfloat16,
                       out_dtype=jnp.float32, epilogue_dtype=jnp.float32,
                       max_tm=4096, vmem_budget_bytes=20 * 2**20):
    """x: (B, Cin, H, W), weight: (Cout, Cin, K, K) — PyTorch conventions."""
    B, Cin, H, W = x.shape
    Cout, Cin_w, k, k2 = weight.shape
    assert Cin == Cin_w and k == k2
    pad = rate * (k - 1) // 2 if padding == "auto" else padding

    Hp, Wp = H + 2 * pad, W + 2 * pad
    Ho = (Hp - rate * (k - 1) - 1) // stride + 1
    Wo = (Wp - rate * (k - 1) - 1) // stride + 1
    assert rate * (k - 1) <= 128, "horizontal halo must fit one 128-lane block"

    cd_b = jnp.dtype(compute_dtype).itemsize
    out_b = jnp.dtype(out_dtype).itemsize
    sub = max(8, 32 // cd_b)                  # sublane packing of compute dtype

    kcin = k * Cin                            # rows per horizontal-tap group
    ckp = _round_up(kcin, sub)                # sublane-aligned group size
    dp = k * ckp                              # fused contraction depth
    M = B * Hp * Wp                           # dense (stride-1) anchor count

    ck_sub = _round_up(kcin, sub)
    coutp = _round_up(Cout, 8)

    def footprint(tm_):
        return (2 * ck_sub * tm_ * cd_b              # input tile, double-buffered
                + 2 * ck_sub * 128 * cd_b            # halo view
                + 2 * coutp * _round_up(dp, 128) * cd_b   # weights
                + 2 * coutp * tm_ * out_b            # output tile, double-buffered
                + dp * tm_ * cd_b                    # im2col VMEM scratch
                + 3 * coutp * tm_ * 4)               # f32 acc + epilogue temps

    # Grow the spatial tile while it fits the VMEM budget (v7x-safe).
    tm = 512
    while tm * 2 <= max_tm and footprint(tm * 2) <= vmem_budget_bytes:
        tm *= 2
    tm = max(128, min(tm, _round_up(M, 128)))
    assert rate * (k - 1) < tm

    m_tiles = pl.cdiv(M, tm)
    Mpad = m_tiles * tm
    Mh = Mpad + 128                           # + one halo block past the last tile

    # ---- host-side layout prep (cheap; NO K^2 patch blow-up) ----------------
    x_pad = jnp.pad(x, ((0, 0), (0, 0), (pad, pad), (pad, pad)))
    x2 = jnp.transpose(x_pad, (1, 0, 2, 3)).reshape(Cin, M).astype(compute_dtype)
    # stack the k vertical taps along the sublane dim, shifted by ki*rate*Wp
    blocks = []
    for ki in range(k):
        off = ki * rate * Wp
        blocks.append(jnp.pad(x2[:, off:], ((0, 0), (0, Mh - (M - off)))))
    x_stack = jnp.concatenate(blocks, axis=0)                 # (k*Cin, Mh)

    # weights -> (Cout, k*ckp): kj-major groups of (ki, c), zero-padded per group
    w_t = jnp.transpose(weight, (3, 0, 2, 1)).reshape(k, Cout, kcin)
    w_t = jnp.pad(w_t, ((0, 0), (0, 0), (0, ckp - kcin)))
    w2 = jnp.transpose(w_t, (1, 0, 2)).reshape(Cout, dp).astype(compute_dtype)

    # 48 MiB cap keeps headroom on v7x's 64 MiB physical VMEM.
    vmem_limit = int(min(48 * 2**20, max(24 * 2**20, 2 * footprint(tm))))

    hstep = tm // 128
    kernel = _make_gated_conv_kernel(k, rate, kcin, ckp, tm, gated, epilogue_dtype)
    o2 = pl.pallas_call(
        kernel,
        out_shape=jax.ShapeDtypeStruct((Cout, Mpad), out_dtype),
        grid_spec=pltpu.PrefetchScalarGridSpec(
            num_scalar_prefetch=0,
            grid=(m_tiles,),
            in_specs=[
                pl.BlockSpec((kcin, tm), lambda i: (0, i)),               # tile i
                pl.BlockSpec((kcin, 128),
                             lambda i: (0, (i + 1) * hstep)),             # right halo
                pl.BlockSpec((Cout, dp), lambda i: (0, 0)),               # weights
            ],
            out_specs=pl.BlockSpec((Cout, tm), lambda i: (0, i)),
            scratch_shapes=[pltpu.VMEM((dp, tm), compute_dtype)],
        ),
        compiler_params=pltpu.CompilerParams(
            dimension_semantics=("parallel",),
            vmem_limit_bytes=vmem_limit),
    )(x_stack, x_stack, w2)

    # ---- back to NCHW; subsample dense anchors when stride > 1 --------------
    o4 = o2[:, :M].reshape(Cout, B, Hp, Wp)
    out = o4[:, :,
             0:(Ho - 1) * stride + 1:stride,
             0:(Wo - 1) * stride + 1:stride]                 # (Cout, B, Ho, Wo)
    return jnp.transpose(out, (1, 0, 2, 3))                  # (B, Cout, Ho, Wo)


# ------------------------------- reference -----------------------------------
def gated_conv_reference(x, weight, *, stride=1, rate=1, padding="auto"):
    Cout, Cin, k, _ = weight.shape
    pad = rate * (k - 1) // 2 if padding == "auto" else padding
    conv = jax.lax.conv_general_dilated(
        x, weight, window_strides=(stride, stride),
        padding=[(pad, pad), (pad, pad)],
        rhs_dilation=(rate, rate),
        dimension_numbers=("NCHW", "OIHW", "NCHW"))
    elu = jnp.where(conv > 0, conv, jnp.expm1(conv))
    return elu * jax.nn.sigmoid(conv)


# --------------------------------- main ---------------------------------------
if __name__ == "__main__":
    key = jax.random.PRNGKey(0)
    kx, kw = jax.random.split(key)

    B, Cin, H, W = 2, 4, 16, 16
    Cout, k = 8, 3

    x = jax.random.normal(kx, (B, Cin, H, W), dtype=jnp.float32)
    # deterministic synthetic conv weight (PyTorch Conv2d shape, bias=False)
    weight = jax.random.normal(kw, (Cout, Cin, k, k), dtype=jnp.float32) * 0.1

    out = gated_conv_forward(x, weight, stride=1, rate=1, padding="auto")
    out = jax.block_until_ready(out)

    ref = gated_conv_reference(x, weight, stride=1, rate=1, padding="auto")
    # bf16 MXU operands + approx reciprocal => loosened tolerance vs f32 ref
    np.testing.assert_allclose(np.asarray(out), np.asarray(ref),
                               rtol=5e-2, atol=5e-2)
    assert out.shape == (B, Cout, H, W)

    print("KERNEL_OK")
</pallas_src>

<mosaic_0001>
module attributes {stable_mosaic.version = 11 : i64} {
  func.func @kernel(%arg0: i32, %arg1: memref<12x768xbf16, #tpu.memory_space<vmem>>, %arg2: memref<12x128xbf16, #tpu.memory_space<vmem>>, %arg3: memref<8x48xbf16, #tpu.memory_space<vmem>>, %arg4: memref<8x768xf32, #tpu.memory_space<vmem>>, %arg5: memref<48x768xbf16, #tpu.memory_space<vmem>>) attributes {dimension_semantics = [#tpu.dimension_semantics<parallel>], iteration_bounds = array<i64: 1>, scalar_prefetch = 0 : i64, scratch_operands = 1 : i64, tpu.core_type = #tpu.core_type<tc>, window_params = [{transform_indices = @transform_0, window_bounds = array<i64: 12, 768>}, {transform_indices = @transform_1, window_bounds = array<i64: 12, 128>}, {pipeline_mode = #tpu.pipeline_mode<synchronous>, transform_indices = @transform_2, window_bounds = array<i64: 8, 48>}, {transform_indices = @transform_3, window_bounds = array<i64: 8, 768>}]} {
    %c0 = arith.constant 0 : index
    %c0_0 = arith.constant 0 : index
    %0 = vector.load %arg1[%c0, %c0_0] : memref<12x768xbf16, #tpu.memory_space<vmem>>, vector<12x768xbf16>
    %c0_1 = arith.constant 0 : index
    %c0_2 = arith.constant 0 : index
    %1 = vector.load %arg2[%c0_1, %c0_2] : memref<12x128xbf16, #tpu.memory_space<vmem>>, vector<12x128xbf16>
    %cst = arith.constant 0.000000e+00 : bf16
    %2 = vector.broadcast %cst : bf16 to vector<4x768xbf16>
    %c0_3 = arith.constant 0 : index
    %c0_4 = arith.constant 0 : index
    %3 = vector.load %arg5[%c0_3, %c0_4] : memref<48x768xbf16, #tpu.memory_space<vmem>>, vector<12x768xbf16>
    tpu.vector_store %arg5[%c0_3, %c0_4], %0 {strides = array<i32>} : memref<48x768xbf16, #tpu.memory_space<vmem>>, vector<12x768xbf16>,
    %c12 = arith.constant 12 : index
    %c0_5 = arith.constant 0 : index
    %4 = vector.load %arg5[%c12, %c0_5] : memref<48x768xbf16, #tpu.memory_space<vmem>>, vector<4x768xbf16>
    tpu.vector_store %arg5[%c12, %c0_5], %2 {strides = array<i32>} : memref<48x768xbf16, #tpu.memory_space<vmem>>, vector<4x768xbf16>,
    %5 = vector.extract_strided_slice %0 {offsets = [0, 1], sizes = [12, 767], strides = [1, 1]} : vector<12x768xbf16> to vector<12x767xbf16>
    %c16 = arith.constant 16 : index
    %c0_6 = arith.constant 0 : index
    %6 = vector.load %arg5[%c16, %c0_6] : memref<48x768xbf16, #tpu.memory_space<vmem>>, vector<12x767xbf16>
    tpu.vector_store %arg5[%c16, %c0_6], %5 {strides = array<i32>} : memref<48x768xbf16, #tpu.memory_space<vmem>>, vector<12x767xbf16>,
    %7 = vector.extract_strided_slice %1 {offsets = [0, 0], sizes = [12, 1], strides = [1, 1]} : vector<12x128xbf16> to vector<12x1xbf16>
    %c16_7 = arith.constant 16 : index
    %c767 = arith.constant 767 : index
    %8 = vector.load %arg5[%c16_7, %c767] : memref<48x768xbf16, #tpu.memory_space<vmem>>, vector<12x1xbf16>
    tpu.vector_store %arg5[%c16_7, %c767], %7 {strides = array<i32>} : memref<48x768xbf16, #tpu.memory_space<vmem>>, vector<12x1xbf16>,
    %c28 = arith.constant 28 : index
    %c0_8 = arith.constant 0 : index
    %9 = vector.load %arg5[%c28, %c0_8] : memref<48x768xbf16, #tpu.memory_space<vmem>>, vector<4x768xbf16>
    tpu.vector_store %arg5[%c28, %c0_8], %2 {strides = array<i32>} : memref<48x768xbf16, #tpu.memory_space<vmem>>, vector<4x768xbf16>,
    %10 = vector.extract_strided_slice %0 {offsets = [0, 2], sizes = [12, 766], strides = [1, 1]} : vector<12x768xbf16> to vector<12x766xbf16>
    %c32 = arith.constant 32 : index
    %c0_9 = arith.constant 0 : index
    %11 = vector.load %arg5[%c32, %c0_9] : memref<48x768xbf16, #tpu.memory_space<vmem>>, vector<12x766xbf16>
    tpu.vector_store %arg5[%c32, %c0_9], %10 {strides = array<i32>} : memref<48x768xbf16, #tpu.memory_space<vmem>>, vector<12x766xbf16>,
    %12 = vector.extract_strided_slice %1 {offsets = [0, 0], sizes = [12, 2], strides = [1, 1]} : vector<12x128xbf16> to vector<12x2xbf16>
    %c32_10 = arith.constant 32 : index
    %c766 = arith.constant 766 : index
    %13 = vector.load %arg5[%c32_10, %c766] : memref<48x768xbf16, #tpu.memory_space<vmem>>, vector<12x2xbf16>
    tpu.vector_store %arg5[%c32_10, %c766], %12 {strides = array<i32>} : memref<48x768xbf16, #tpu.memory_space<vmem>>, vector<12x2xbf16>,
    %c44 = arith.constant 44 : index
    %c0_11 = arith.constant 0 : index
    %14 = vector.load %arg5[%c44, %c0_11] : memref<48x768xbf16, #tpu.memory_space<vmem>>, vector<4x768xbf16>
    tpu.vector_store %arg5[%c44, %c0_11], %2 {strides = array<i32>} : memref<48x768xbf16, #tpu.memory_space<vmem>>, vector<4x768xbf16>,
    %c0_12 = arith.constant 0 : index
    %c0_13 = arith.constant 0 : index
    %15 = vector.load %arg3[%c0_12, %c0_13] : memref<8x48xbf16, #tpu.memory_space<vmem>>, vector<8x48xbf16>
    %c0_14 = arith.constant 0 : index
    %c0_15 = arith.constant 0 : index
    %16 = vector.load %arg5[%c0_14, %c0_15] : memref<48x768xbf16, #tpu.memory_space<vmem>>, vector<48x768xbf16>
    %cst_16 = arith.constant dense<0.000000e+00> : vector<8x768xf32>
    %17 = tpu.matmul %15, %16, %cst_16 {dimension_numbers = #tpu.dot_dimension_numbers<[1], [0], [0], [1], [0, 0, 1, 1], [], []>} : vector<8x48xbf16>, vector<48x768xbf16>, vector<8x768xf32> -> vector<8x768xf32>
    %18 = math.absf %17 : vector<8x768xf32>
    %cst_17 = arith.constant 0.000000e+00 : f32
    %19 = vector.broadcast %cst_17 : f32 to vector<8x768xf32>
    %20 = arith.subf %19, %18 : vector<8x768xf32>
    %21 = math.exp %20 : vector<8x768xf32>
    %cst_18 = arith.constant 1.000000e+00 : f32
    %22 = vector.broadcast %cst_18 : f32 to vector<8x768xf32>
    %23 = arith.addf %22, %21 : vector<8x768xf32>
    %24 = tpu.reciprocal %23 {approx = true} : vector<8x768xf32> -> vector<8x768xf32>
    %cst_19 = arith.constant 0.000000e+00 : f32
    %25 = vector.broadcast %cst_19 : f32 to vector<8x768xf32>
    %26 = arith.cmpf ogt, %17, %25 : vector<8x768xf32>
    %cst_20 = arith.constant 1.000000e+00 : f32
    %27 = vector.broadcast %cst_20 : f32 to vector<8x768xf32>
    %28 = arith.subf %21, %27 : vector<8x768xf32>
    %29 = arith.mulf %28, %21 : vector<8x768xf32>
    %30 = arith.select %26, %17, %29 : vector<8x768xi1>, vector<8x768xf32>
    %31 = arith.mulf %24, %30 : vector<8x768xf32>
    %c0_21 = arith.constant 0 : index
    %c0_22 = arith.constant 0 : index
    %32 = vector.load %arg4[%c0_21, %c0_22] : memref<8x768xf32, #tpu.memory_space<vmem>>, vector<8x768xf32>
    tpu.vector_store %arg4[%c0_21, %c0_22], %31 {strides = array<i32>} : memref<8x768xf32, #tpu.memory_space<vmem>>, vector<8x768xf32>,
    return
  }
  func.func @transform_0(%arg0: i32) -> (i32, i32) {
    %c0_i32 = arith.constant 0 : i32
    %c0_i32_0 = arith.constant 0 : i32
    return %c0_i32, %arg0 : i32, i32
  }
  func.func @transform_1(%arg0: i32) -> (i32, i32) {
    %c1_i32 = arith.constant 1 : i32
    %0 = arith.addi %arg0, %c1_i32 : i32
    %c6_i32 = arith.constant 6 : i32
    %1 = arith.muli %0, %c6_i32 : i32
    %c0_i32 = arith.constant 0 : i32
    %c0_i32_0 = arith.constant 0 : i32
    return %c0_i32, %1 : i32, i32
  }
  func.func @transform_2(%arg0: i32) -> (i32, i32) {
    %c0_i32 = arith.constant 0 : i32
    %c0_i32_0 = arith.constant 0 : i32
    %c0_i32_1 = arith.constant 0 : i32
    return %c0_i32, %c0_i32_0 : i32, i32
  }
  func.func @transform_3(%arg0: i32) -> (i32, i32) {
    %c0_i32 = arith.constant 0 : i32
    %c0_i32_0 = arith.constant 0 : i32
    return %c0_i32, %arg0 : i32, i32
  }
}

</mosaic_0001>

<bundles_post_ra>
// kernel: tpu_custom_call.1
= control target key start
LH: loop header
LB: loop body
LE: loop exit
PB: predicated region body
PF: predicated region fallthrough
CT: control target
= control target key end

     0   :  { %8 = vsyncpa [#allocation4], 0  ;;  %s826_s0 = inlined_call_operand.hbm [shape: bf16[12,896], index: 0, kind: input, shape index: {}]   ;;  %s827_s1 = inlined_call_operand.hbm [shape: bf16[12,896], index: 1, kind: input, shape index: {}]   ;;  %s828_s2 = inlined_call_operand.hbm [shape: bf16[8,48], index: 2, kind: input, shape index: {}]   ;;  %s829_s3 = inlined_call_operand.hbm [shape: f32[8,768], index: 3, kind: output, shape index: {}]  }
   0x1   :  { %9 = vsyncpa [#allocation7], 0  ;;  %s492_s14 = scalar_lea.hbm %s827_s1, 24 }
   0x2   :  { %10 = vsyncpa [#allocation5], 0  ;;  %s32_s15 = sshll.u32 %s492_s14, 4  ;;  %s733_s16 = smov [#allocation6]   ;;  %s33_s15 = int_to_ptr.hbm [resolvable:$true] %s32_s15 }
   0x3   :  { %s34_s17 = sshll.u32 %s733_s16, 4  ;;  %s15_s20 = sshll.u32 %s826_s0, 4  ;;  %s35_s17 = int_to_ptr.vmem [resolvable:$true] %s34_s17  ;;  %s16_s20 = int_to_ptr.hbm [resolvable:$true] %s15_s20 }
   0x4   :  { %s734_s21 = smov 448   ;;  %s735_s22 = smov 64  }
   0x5   :  { %s736_s23 = smov 4   ;;  %s737_s24 = smov [#allocation3]  }
   0x6   :  { %40 = dma.hbm_to_vmem [thread:$0]  %s33_s15, 128, %s35_s17, [#allocation7], %s734_s21, %s735_s22, %s736_s23  }
   0x7   :  { %s17_s25 = sshll.u32 %s737_s24, 4  ;;  %s738_s26 = smov 384   ;;  %s18_s25 = int_to_ptr.vmem [resolvable:$true] %s17_s25 }
   0x8   :  { %s739_s1 = smov 24   ;;  %s46_s29 = sshll.u32 %s828_s2, 4  ;;  %s47_s29 = int_to_ptr.hbm [resolvable:$true] %s46_s29 }
   0x9   :  { %23 = dma.hbm_to_vmem [thread:$0]  %s16_s20, 768, %s18_s25, [#allocation4], %s734_s21, %s738_s26, %s739_s1  }
   0xa   :  { %s740_s30 = smov [#allocation8]  }
   0xb   :  { %s48_s4 = sshll.u32 %s740_s30, 4  ;;  %s49_s4 = int_to_ptr.vmem [resolvable:$true] %s48_s4 }
   0xc   :  { %51 = dma.hbm_to_vmem [thread:$0]  %s47_s29, 64, %s49_s4, [#allocation7]  }
   0xd   :  { %727 = dma.done.wait [#allocation4], 768  }
   0xe   :  { %728 = vsyncadd [#allocation4], 4294966528 }
   0xf   :  { %729 = dma.done.wait [#allocation7], 192  }
  0x10   :  { %730 = vsyncadd [#allocation7], 4294967104  ;;  %v70_v0 = vld [vmem:[#allocation3 + $0x18] sm:$0x33]  ;;  %v67_v1 = vld [vmem:[#allocation3] sm:$0xff]  ;;  %s741_s0 = smov 126  }
  0x11   :  { %159 = vrot.lane.b32.xlu1 %v70_v0, %s741_s0  ;;  %78 = vst [vmem:[#allocation2 + $0x18] sm:$0x33] %v70_v0  ;;  %153 = vrot.lane.b32.xlu0 %v67_v1, %s741_s0  ;;  %v71_v2 = vld [vmem:[#allocation3 + $0x20] sm:$0x33]  ;;  %s742_s5 = smov 127   ;;  %v68_v3 = vld [vmem:[#allocation3 + $0x8] sm:$0xff] }
  0x12   :  { %75 = vst [vmem:[#allocation2] sm:$0xff] %v67_v1  ;;  %90 = vrot.lane.b32.xlu2 %v67_v1, %s742_s5  ;;  %v69_v4 = vld [vmem:[#allocation3 + $0x10] sm:$0xff]  ;;  %v72_v5 = vld [vmem:[#allocation3 + $0x28] sm:$0x33]  ;;  %v743_v9 = vmov 0   ;;  %vm108_vm0 = vcmask 1043456  }
  0x13   :  { %79 = vst [vmem:[#allocation2 + $0x20] sm:$0x33] %v71_v2  ;;  %v74_v6 = vld [vmem:[#allocation6 + $0x4] sm:$0x3]  ;;  %v73_v7 = vld [vmem:[#allocation6] sm:$0xf] }
  0x14   :  { %76 = vst [vmem:[#allocation2 + $0x8] sm:$0xff] %v68_v3  ;;  %vm110_vm1 = vcmask 1039360   ;;  %vm190_vm2 = vcmask 1031172   ;;  %vm172_vm4 = vcmask 1031168   ;;  %vm135_vm5 = vcmask 1037316   ;;  %s744_s2 = smov [#allocation9]  }
  0x15   :  { %77 = vst [vmem:[#allocation2 + $0x10] sm:$0xff] %v69_v4  ;;  %vm191_vm3 = vmor %vm190_vm2, %vm108_vm0  ;;  %vm134_vm6 = vcmask 1041408   ;;  %vm129_vm8 = vcmask 1039364   ;;  %vm195_vm10 = vcmask 1029124   ;;  %vm146_vm12 = vcmask 1044472   ;;  %s479_s6 = sshll.u32 %s744_s2, 4  ;;  %s480_s6 = int_to_ptr.vmem [resolvable:$true] %s479_s6 }
  0x16   :  { %80 = vst [vmem:[#allocation2 + $0x28] sm:$0x33] %v72_v5  ;;  %vm136_vm7 = vmor %vm135_vm5, %vm134_vm6  ;;  %vm206_vm13 = vcmask 1042416   ;;  %vm204_vm14 = vcmask 1044464   ;;  %vm320_vm15 = vcmask 392192   ;;  %s481_s9 = sshll.u32 %s829_s3, 4  ;;  %s482_s9 = int_to_ptr.hbm [resolvable:$true] %s481_s9 }
  0x17   :  { %208 = vst [vmem:[#allocation2 + $0x78] sm:$0xcc] %v743_v9  ;;  %vm130_vm9 = vmor %vm129_vm8, %vm108_vm0 }
  0x18   :  { %81 = vst [vmem:[#allocation2 + $0x18] sm:$0xcc] %v743_v9  ;;  %vm196_vm11 = vmor %vm195_vm10, %vm134_vm6 }
  0x19   :  { %161 = vrot.lane.b32.xlu1 %v71_v2, %s741_s0  ;;  %155 = vrot.lane.b32.xlu0 %v68_v3, %s741_s0  ;;  %82 = vst [vmem:[#allocation2 + $0x20] sm:$0xcc] %v743_v9  ;;  %v495_v58 = vld [vmem:[#allocation2] sm:$0xf]  ;;  %v577_v63 = vld [vmem:[#allocation2 + $0x4] sm:$0xf] }
  0x1a   :  { %92 = vrot.lane.b32.xlu2 %v68_v3, %s742_s5  ;;  %83 = vst [vmem:[#allocation2 + $0x28] sm:$0xcc] %v743_v9 }
  0x1b   :  { %150 = vst [vmem:[#allocation2 + $0x48] sm:$0xcc] %v743_v9 }
  0x1c   :  { %151 = vst [vmem:[#allocation2 + $0x50] sm:$0xcc] %v743_v9 }
  0x1d   :  { %152 = vst [vmem:[#allocation2 + $0x58] sm:$0xcc] %v743_v9 }
  0x1e   :  { %209 = vst [vmem:[#allocation2 + $0x80] sm:$0xcc] %v743_v9 }
  0x1f   :  { %210 = vst [vmem:[#allocation2 + $0x88] sm:$0xcc] %v743_v9  ;;  %v580_v59 = vld [vmem:[#allocation2 + $0x14] sm:$0xf0] }
  0x21   :  { %98 = vrot.lane.b32.xlu1 %v71_v2, %s742_s5  ;;  %96 = vrot.lane.b32.xlu0 %v70_v0, %s742_s5  ;;  %v497_v0 = vld [vmem:[#allocation2 + $0x18] sm:$0xf0] }
  0x22   :  { %157 = vrot.lane.b32.xlu2 %v69_v4, %s741_s0  ;;  %v500_v9 = vor.u32 %v577_v63, %v497_v0 }
  0x29   :  { %94 = vrot.lane.b32.xlu1 %v69_v4, %s742_s5  ;;  %163 = vrot.lane.b32.xlu0 %v72_v5, %s741_s0 }
  0x2a   :  { %100 = vrot.lane.b32.xlu2 %v72_v5, %s742_s5 }
  0x31   :  { %200 = vrot.lane.b32.xlu1 %v74_v6, %s741_s0  ;;  %198 = vrot.lane.b32.xlu0 %v73_v7, %s741_s0 }
  0x32   :  { %140 = vrot.lane.b32.xlu2 %v73_v7, %s742_s5 }
  0x39   :  { %142 = vrot.lane.b32.xlu0 %v74_v6, %s742_s5 }
  0x6c   :  { %v91_v8 = vpop.permute.xlu2 %90 }
  0x6d   :  { %v102_v10 = vrot.slane %v91_v8, 4 }
  0x74   :  { %v774_v11 = vpop.permute.xlu2 %92 }
  0x75   :  { %v103_v12 = vrot.slane %v774_v11, 4 }
  0x77   :  { %v109_v13 = vsel %vm108_vm0, %v102_v10, %v103_v12  ;;  %v211_v10 = vld [vmem:[#allocation8] sm:$0xf] }
  0x78   :  { %v111_v14 = vsel %vm110_vm1, %v91_v8, %v109_v13  ;;  %v496_v8 = vor.u32 %v580_v59, %v495_v58 }
  0x79   :  { %126 = vst [vmem:[#allocation2 + $0x30] sm:$0xff] %v111_v14 }
  0x7c   :  { %v158_v15 = vpop.permute.xlu2 %157 }
  0x7d   :  { %v167_v16 = vrot.slane %v158_v15, 4 }
  0x7f   :  { %v176_v17 = vsel %vm172_vm4, %v158_v15, %v167_v16 }
  0x80   :  { %192 = vst.msk [vmem:[#allocation2 + $0x70] sm:$0xff] %vm191_vm3, %v176_v17  ;;  %v519_v56 = vld [vmem:[#allocation2 + $0x30] sm:$0xf]  ;;  %v583_v57 = vld [vmem:[#allocation2 + $0x34] sm:$0xf] }
  0x83   :  { %v160_v18 = vpop.permute.xlu1 %159  ;;  %v154_v19 = vpop.permute.xlu0 %153 }
  0x84   :  { %v101_v20 = vpop.permute.xlu2 %100  ;;  %v168_v25 = vrot.slane %v160_v18, 4  ;;  %v165_v26 = vrot.slane %v154_v19, 4 }
  0x85   :  { %v107_v21 = vrot.slane %v101_v20, 4 }
  0x87   :  { %v119_v22 = vsel %vm110_vm1, %v101_v20, %v107_v21 }
  0x88   :  { %137 = vst.msk [vmem:[#allocation2 + $0x58] sm:$0x33] %vm136_vm7, %v119_v22 }
  0x8b   :  { %v162_v23 = vpop.permute.xlu1 %161  ;;  %v156_v24 = vpop.permute.xlu0 %155 }
  0x8c   :  { %v169_v27 = vrot.slane %v162_v23, 4  ;;  %v166_v28 = vrot.slane %v156_v24, 4  ;;  %v141_v3 = vpop.permute.xlu2 %140 }
  0x8e   :  { %v177_v29 = vsel %vm108_vm0, %v168_v25, %v169_v27  ;;  %v171_v30 = vsel %vm108_vm0, %v165_v26, %v166_v28  ;;  %v174_v31 = vsel %vm108_vm0, %v166_v28, %v167_v16  ;;  %v578_v25 = vld [vmem:[#allocation2 + $0xc] sm:$0xf]  ;;  %v505_v26 = vld [vmem:[#allocation2 + $0x20] sm:$0xf0] }
  0x8f   :  { %v178_v32 = vsel %vm172_vm4, %v160_v18, %v177_v29  ;;  %v173_v33 = vsel %vm172_vm4, %v154_v19, %v171_v30  ;;  %v175_v34 = vsel %vm172_vm4, %v156_v24, %v174_v31  ;;  %v588_v19 = vld [vmem:[#allocation2 + $0x54] sm:$0xf0]  ;;  %v581_v24 = vld [vmem:[#allocation2 + $0x1c] sm:$0xf0] }
  0x90   :  { %193 = vst [vmem:[#allocation2 + $0x78] sm:$0x33] %v178_v32 }
  0x91   :  { %188 = vst [vmem:[#allocation2 + $0x60] sm:$0xff] %v173_v33 }
  0x92   :  { %189 = vst [vmem:[#allocation2 + $0x68] sm:$0xff] %v175_v34 }
  0x93   :  { %v99_v35 = vpop.permute.xlu1 %98  ;;  %v97_v36 = vpop.permute.xlu0 %96 }
  0x94   :  { %v106_v37 = vrot.slane %v99_v35, 4  ;;  %v105_v38 = vrot.slane %v97_v36, 4 }
  0x96   :  { %v117_v39 = vsel %vm108_vm0, %v106_v37, %v107_v21  ;;  %v115_v40 = vsel %vm108_vm0, %v105_v38, %v106_v37  ;;  %v582_v37 = vld [vmem:[#allocation2 + $0x24] sm:$0xf0] }
  0x97   :  { %v118_v41 = vsel %vm110_vm1, %v99_v35, %v117_v39  ;;  %v116_v42 = vsel %vm110_vm1, %v97_v36, %v115_v40  ;;  %v592_v43 = vld [vmem:[#allocation2 + $0x74] sm:$0xf0]  ;;  %v545_v44 = vld [vmem:[#allocation2 + $0x78] sm:$0xf0]  ;;  %v511_v36 = vld [vmem:[#allocation2 + $0x10] sm:$0xf]  ;;  %v508_v40 = vor.u32 %v578_v25, %v505_v26 }
  0x98   :  { %133 = vst [vmem:[#allocation2 + $0x50] sm:$0x33] %v118_v41  ;;  %v543_v45 = vld [vmem:[#allocation2 + $0x60] sm:$0xf]  ;;  %v589_v46 = vld [vmem:[#allocation2 + $0x64] sm:$0xf]  ;;  %v512_v41 = vor.u32 %v582_v37, %v511_v36 }
  0x99   :  { %132 = vst [vmem:[#allocation2 + $0x48] sm:$0x33] %v116_v42  ;;  %v544_v47 = vor.u32 %v592_v43, %v543_v45  ;;  %v548_v48 = vor.u32 %v589_v46, %v545_v44  ;;  %v590_v14 = vld [vmem:[#allocation2 + $0x6c] sm:$0xf]  ;;  %v579_v45 = vld [vmem:[#allocation2 + $0x14] sm:$0xf] }
  0x9a   :  { %v513_v46 = vld [vmem:[#allocation2 + $0x28] sm:$0xf0] }
  0x9b   :  { %329 = vmatpush.bf16.msra.mxu0 %v544_v47  ;;  %342 = vmatpush.bf16.msra.mxu1 %v548_v48  ;;  %v95_v49 = vpop.permute.xlu1 %94  ;;  %v164_v50 = vpop.permute.xlu0 %163  ;;  %v516_v47 = vor.u32 %v579_v45, %v513_v46 }
  0x9c   :  { %v104_v51 = vrot.slane %v95_v49, 4  ;;  %v170_v52 = vrot.slane %v164_v50, 4 }
  0x9e   :  { %v112_v53 = vsel %vm108_vm0, %v103_v12, %v104_v51  ;;  %v114_v54 = vsel %vm110_vm1, %v95_v49, %v104_v51  ;;  %v179_v55 = vsel %vm108_vm0, %v169_v27, %v170_v52  ;;  %v181_v62 = vsel %vm172_vm4, %v164_v50, %v170_v52  ;;  %v551_v12 = vld [vmem:[#allocation2 + $0x68] sm:$0xf] }
  0x9f   :  { %v113_v60 = vsel %vm110_vm1, %v774_v11, %v112_v53  ;;  %131 = vst.msk [vmem:[#allocation2 + $0x40] sm:$0xff] %vm130_vm9, %v114_v54  ;;  %v180_v61 = vsel %vm172_vm4, %v162_v23, %v179_v55  ;;  %v559_v11 = vld [vmem:[#allocation2 + $0x70] sm:$0xf]  ;;  %vm148_vm0 = vcmask 1042424   ;;  %v503_v23 = vld [vmem:[#allocation2 + $0x8] sm:$0xf] }
  0xa0   :  { %127 = vst [vmem:[#allocation2 + $0x38] sm:$0xff] %v113_v60  ;;  %v586_v1 = vld [vmem:[#allocation2 + $0x44] sm:$0xf0]  ;;  %v521_v2 = vld [vmem:[#allocation2 + $0x48] sm:$0xf0]  ;;  %v504_v39 = vor.u32 %v581_v24, %v503_v23 }
  0xa1   :  { %194 = vst [vmem:[#allocation2 + $0x80] sm:$0x33] %v180_v61  ;;  %v520_v4 = vor.u32 %v586_v1, %v519_v56  ;;  %v524_v5 = vor.u32 %v583_v57, %v521_v2  ;;  %v587_v29 = vld [vmem:[#allocation2 + $0x4c] sm:$0xf0]  ;;  %v529_v31 = vld [vmem:[#allocation2 + $0x50] sm:$0xf0] }
  0xa2   :  { %197 = vst.msk [vmem:[#allocation2 + $0x88] sm:$0x33] %vm196_vm11, %v181_v62 }
  0xa3   :  { %330 = vmatpush.bf16.msra.mxu0 %v520_v4  ;;  %343 = vmatpush.bf16.msra.mxu1 %v524_v5  ;;  %v201_v6 = vpop.permute.xlu1 %200  ;;  %v199_v7 = vpop.permute.xlu0 %198  ;;  %147 = vst.msk [vmem:[#allocation2 + $0x44] sm:$0xf] %vm146_vm12, %v141_v3 }
  0xa4   :  { %207 = vst.msk [vmem:[#allocation2 + $0x8c] sm:$0x3] %vm206_vm13, %v201_v6 }
  0xa5   :  { %205 = vst.msk [vmem:[#allocation2 + $0x74] sm:$0xf] %vm204_vm14, %v199_v7 }
  0xa6   :  { %v535_v28 = vld [vmem:[#allocation2 + $0x40] sm:$0xf] }
  0xa7   :  { %331 = vmatpush.bf16.msra.mxu0 %v496_v8  ;;  %344 = vmatpush.bf16.msra.mxu1 %v500_v9  ;;  %v527_v21 = vld [vmem:[#allocation2 + $0x38] sm:$0xf]  ;;  %v584_v22 = vld [vmem:[#allocation2 + $0x3c] sm:$0xf]  ;;  %v536_v38 = vor.u32 %v588_v19, %v535_v28 }
  0xa8   :  { %v593_v13 = vld [vmem:[#allocation2 + $0x7c] sm:$0xf0]  ;;  %v553_v15 = vld [vmem:[#allocation2 + $0x80] sm:$0xf0]  ;;  %v528_v33 = vor.u32 %v587_v29, %v527_v21  ;;  %v532_v34 = vor.u32 %v584_v22, %v529_v31 }
  0xa9   :  { %v594_v16 = vld [vmem:[#allocation2 + $0x84] sm:$0xf0]  ;;  %v552_v17 = vor.u32 %v593_v13, %v551_v12  ;;  %v556_v18 = vor.u32 %v590_v14, %v553_v15 }
  0xaa   :  { %565 = vmatmul.msk.bf16.vlgmr.msra.gmra.mxu0 %vm320_vm15, %v211_v10  ;;  %566 = vmatmul.msk.bf16.vlgmr.msra.gmra.mxu1 %vm320_vm15, %v211_v10  ;;  %v560_v20 = vor.u32 %v594_v16, %v559_v11  ;;  %v585_v42 = vld [vmem:[#allocation2 + $0x44] sm:$0xf] }
  0xab   :  { %355 = vmatpush.bf16.msra.mxu2 %v552_v17  ;;  %368 = vmatpush.bf16.msra.mxu3 %v556_v18  ;;  %v143_v27 = vpop.permute.xlu0 %142  ;;  %v561_v30 = vld [vmem:[#allocation2 + $0x88] sm:$0xf0] }
  0xac   :  { %381 = vmatpush.bf16.msrb.mxu0 %v560_v20  ;;  %149 = vst.msk [vmem:[#allocation2 + $0x5c] sm:$0x3] %vm148_vm0, %v143_v27  ;;  %v591_v32 = vld [vmem:[#allocation2 + $0x74] sm:$0xf] }
  0xad   :  { %v564_v35 = vor.u32 %v591_v32, %v561_v30 }
  0xaf   :  { %356 = vmatpush.bf16.msra.mxu2 %v528_v33  ;;  %369 = vmatpush.bf16.msra.mxu3 %v532_v34 }
  0xb0   :  { %382 = vmatpush.bf16.msrb.mxu0 %v536_v38  ;;  %394 = vmatpush.bf16.msrb.mxu1 %v564_v35 }
  0xb3   :  { %357 = vmatpush.bf16.msra.mxu2 %v504_v39  ;;  %370 = vmatpush.bf16.msra.mxu3 %v508_v40  ;;  %v537_v43 = vld [vmem:[#allocation2 + $0x58] sm:$0xf0] }
  0xb4   :  { %383 = vmatpush.bf16.msrb.mxu0 %v512_v41  ;;  %v540_v44 = vor.u32 %v585_v42, %v537_v43 }
  0xb6   :  { %567 = vmatmul.msk.bf16.vlgmr.msra.gmra.mxu2 %vm320_vm15, %v211_v10  ;;  %568 = vmatmul.msk.bf16.vlgmr.msra.gmra.mxu3 %vm320_vm15, %v211_v10 }
  0xb7   :  { %395 = vmatpush.bf16.msrb.mxu1 %v540_v44 }
  0xba   :  { %569 = vmatmul.msk.bf16.vlgmr.msrb.gmra.mxu0 %vm320_vm15, %v211_v10 }
  0xbb   :  { %396 = vmatpush.bf16.msrb.mxu1 %v516_v47 }
  0xbe   :  { %570 = vmatmul.msk.bf16.vlgmr.msrb.gmra.mxu1 %vm320_vm15, %v211_v10 }
 0x127   :  { %v333_v48 = vpop.f32.mrf.mxu0  ;;  %v346_v49 = vpop.f32.mrf.mxu1 }
 0x128   :  { %v402_v50 = vand.u32 2147483647, %v333_v48  ;;  %v403_v51 = vand.u32 2147483647, %v346_v49  ;;  %vm438_vm1 = vcmp.gt.f32.partialorder %v333_v48, 0.0  ;;  %vm439_vm2 = vcmp.gt.f32.partialorder %v346_v49, 0.0 }
 0x12a   :  { %v408_v52 = vsub.f32 0.0, %v402_v50  ;;  %v409_v53 = vsub.f32 0.0, %v403_v51 }
 0x12c   :  { %v414_v54 = vmul.f32 1.442695, %v408_v52  ;;  %v416_v55 = vmul.f32 1.442695, %v409_v53 }
 0x12e   :  { %607 = vpow2.f32 %v414_v54 }
 0x12f   :  { %609 = vpow2.f32 %v416_v55  ;;  %v335_v56 = vpop.f32.mrf.mxu0  ;;  %v348_v57 = vpop.f32.mrf.mxu1 }
 0x134   :  { %v608_v58 = vpop.eup %607 }
 0x135   :  { %v610_v59 = vpop.eup %609  ;;  %v426_v60 = vadd.f32 1.0, %v608_v58  ;;  %v571_v61 = vadd.f32 -1.0, %v608_v58 }
 0x136   :  { %v427_v62 = vadd.f32 1.0, %v610_v59  ;;  %v572_v63 = vadd.f32 -1.0, %v610_v59 }
 0x137   :  { %611 = vrcp.f32 %v426_v60  ;;  %v385_v0 = vpop.f32.mrf.mxu0  ;;  %v450_v2 = vmul.f32 %v608_v58, %v571_v61 }
 0x138   :  { %613 = vrcp.f32 %v427_v62  ;;  %v406_v1 = vand.u32 2147483647, %v385_v0  ;;  %v451_v3 = vmul.f32 %v610_v59, %v572_v63  ;;  %vm442_vm3 = vcmp.gt.f32.partialorder %v385_v0, 0.0 }
 0x139   :  { %v359_v4 = vpop.f32.mrf.mxu2  ;;  %v813_v5 = vpop.f32.mrf.mxu3  ;;  %v456_v14 = vsel %vm438_vm1, %v333_v48, %v450_v2 }
 0x13a   :  { %v412_v6 = vsub.f32 0.0, %v406_v1  ;;  %v404_v7 = vand.u32 2147483647, %v359_v4  ;;  %v405_v8 = vand.u32 2147483647, %v813_v5  ;;  %v457_v15 = vsel %vm439_vm2, %v346_v49, %v451_v3 }
 0x13b   :  { %v816_v9 = vpop.f32.mrf.mxu1  ;;  %vm440_vm4 = vcmp.gt.f32.partialorder %v359_v4, 0.0  ;;  %vm441_vm5 = vcmp.gt.f32.partialorder %v813_v5, 0.0 }
 0x13c   :  { %v422_v10 = vmul.f32 1.442695, %v412_v6  ;;  %v410_v11 = vsub.f32 0.0, %v404_v7  ;;  %v407_v12 = vand.u32 2147483647, %v816_v9  ;;  %v411_v16 = vsub.f32 0.0, %v405_v8 }
 0x13d   :  { %v612_v13 = vpop.eup %611  ;;  %vm443_vm6 = vcmp.gt.f32.partialorder %v816_v9, 0.0 }
 0x13e   :  { %v614_v17 = vpop.eup %613  ;;  %v462_v18 = vmul.f32 %v612_v13, %v456_v14  ;;  %615 = vpow2.f32 %v422_v10  ;;  %v418_v19 = vmul.f32 1.442695, %v410_v11  ;;  %v413_v20 = vsub.f32 0.0, %v407_v12 }
 0x13f   :  { %v463_v21 = vmul.f32 %v614_v17, %v457_v15  ;;  %v420_v22 = vmul.f32 1.442695, %v411_v16  ;;  %v387_v23 = vpop.f32.mrf.mxu0 }
 0x140   :  { %468 = vst [vmem:[#allocation9] sm:$0xff] %v462_v18  ;;  %617 = vpow2.f32 %v418_v19  ;;  %v424_v24 = vmul.f32 1.442695, %v413_v20 }
 0x141   :  { %469 = vst [vmem:[#allocation9 + $0x8] sm:$0xff] %v463_v21  ;;  %619 = vpow2.f32 %v420_v22  ;;  %v361_v25 = vpop.f32.mrf.mxu2  ;;  %v374_v26 = vpop.f32.mrf.mxu3 }
 0x142   :  { %621 = vpow2.f32 %v424_v24 }
 0x143   :  { %v400_v27 = vpop.f32.mrf.mxu1 }
 0x144   :  { %v616_v28 = vpop.eup %615 }
 0x145   :  { %v430_v29 = vadd.f32 1.0, %v616_v28  ;;  %v575_v30 = vadd.f32 -1.0, %v616_v28 }
 0x146   :  { %v618_v31 = vpop.eup %617 }
 0x147   :  { %v620_v32 = vpop.eup %619  ;;  %623 = vrcp.f32 %v430_v29  ;;  %v428_v33 = vadd.f32 1.0, %v618_v31  ;;  %v573_v34 = vadd.f32 -1.0, %v618_v31  ;;  %v454_v38 = vmul.f32 %v616_v28, %v575_v30 }
 0x148   :  { %v622_v35 = vpop.eup %621  ;;  %v429_v36 = vadd.f32 1.0, %v620_v32  ;;  %v574_v37 = vadd.f32 -1.0, %v620_v32 }
 0x149   :  { %625 = vrcp.f32 %v428_v33  ;;  %v431_v39 = vadd.f32 1.0, %v622_v35  ;;  %v576_v40 = vadd.f32 -1.0, %v622_v35  ;;  %v452_v41 = vmul.f32 %v618_v31, %v573_v34 }
 0x14a   :  { %627 = vrcp.f32 %v429_v36  ;;  %v453_v42 = vmul.f32 %v620_v32, %v574_v37  ;;  %v460_v44 = vsel %vm442_vm3, %v385_v0, %v454_v38 }
 0x14b   :  { %629 = vrcp.f32 %v431_v39  ;;  %v455_v45 = vmul.f32 %v622_v35, %v576_v40  ;;  %v458_v48 = vsel %vm440_vm4, %v359_v4, %v452_v41 }
 0x14c   :  { %v459_v51 = vsel %vm441_vm5, %v813_v5, %v453_v42 }
 0x14d   :  { %v624_v43 = vpop.eup %623  ;;  %v461_v54 = vsel %vm443_vm6, %v816_v9, %v455_v45 }
 0x14e   :  { %v466_v46 = vmul.f32 %v624_v43, %v460_v44 }
 0x14f   :  { %v626_v47 = vpop.eup %625 }
 0x150   :  { %v628_v49 = vpop.eup %627  ;;  %472 = vst [vmem:[#allocation9 + $0x20] sm:$0xff] %v466_v46  ;;  %v464_v50 = vmul.f32 %v626_v47, %v458_v48 }
 0x151   :  { %v630_v52 = vpop.eup %629  ;;  %v465_v53 = vmul.f32 %v628_v49, %v459_v51 }
 0x152   :  { %470 = vst [vmem:[#allocation9 + $0x10] sm:$0xff] %v464_v50  ;;  %v467_v55 = vmul.f32 %v630_v52, %v461_v54 }
 0x153   :  { %471 = vst [vmem:[#allocation9 + $0x18] sm:$0xff] %v465_v53 }
 0x154   :  { %473 = vst [vmem:[#allocation9 + $0x28] sm:$0xff] %v467_v55 }
 0x155   :  { %484 = dma.vmem_to_hbm [thread:$0]  %s480_s6, 768, %s482_s9, [#allocation5]  }
 0x156   :  { %731 = dma.done.wait [#allocation5], 768  }
 0x157   :  { %732 = vsyncadd [#allocation5], 4294966528 }
 0x158   :  { %489 = vsyncpa [#allocation4], 1 }
 0x159   :  { %490 = vsyncpa [#allocation7], 1 }
 0x15a   :  { %491 = vsyncpa [#allocation5], 1 }

</bundles_post_ra>
